<compile_context>
chip_gen: v6e
topology: v6e:2x2x1
jax: 0.10.0
libtpu: 0.0.40
codegen_flags: <defaults>
</compile_context>

<pallas_src>
import functools

import jax
import jax.numpy as jnp
from jax.experimental import pallas as pl
from jax.experimental.pallas import tpu as pltpu


def _round_up(a, m):
    return (a + m - 1) // m * m


# ---------------------------------------------------------------------------
# Fused encoder kernel: L x (GIN layer + ReLU + BatchNorm) + group head.
#   grid = (num_layers, num_node_tiles)   -- both axes sequential ("arbitrary")
#   xn_ref  : (L*N_pad, P) output, VMEM-resident; holds pre-BN values of layer l
#             until the start of phase l+1, when they are normalized in place.
#   xg_ref  : (L*B*k_pad, P) output, written at the final grid step.
# ---------------------------------------------------------------------------
def _fused_encoder_kernel(
    # inputs
    adj_ref, x_ref, w1_ref, b1_ref, w2_ref, b2_ref, wgt_ref, bg_ref,
    mask_rep_ref, rep_ref,
    # outputs
    xn_ref, xg_ref,
    # scratch
    h_in_ref, sum_ref, sqsum_ref,
    *, n_real, n_pad, tile, num_layers, num_groups, k_pad, num_graphs, eps,
):
    l = pl.program_id(0)
    i = pl.program_id(1)
    num_tiles = pl.num_programs(1)
    inv_n = 1.0 / float(n_real)

    # ---- layer-phase start (first node tile of layer l) --------------------
    @pl.when(i == 0)
    def _():
        @pl.when(l == 0)
        def _():
            h_in_ref[...] = x_ref[...]          # raw (padded) node features

        @pl.when(l > 0)
        def _():
            # finalize BatchNorm of layer l-1 using stats gathered in phase l-1
            mean = sum_ref[...] * inv_n
            var = sqsum_ref[...] * inv_n - mean * mean
            inv_std = jax.lax.rsqrt(var + eps)
            prev = pl.multiple_of((l - 1) * n_pad, n_pad)
            h_norm = (xn_ref[pl.ds(prev, n_pad), :] - mean) * inv_std
            xn_ref[pl.ds(prev, n_pad), :] = h_norm   # normalized slice of x_n
            h_in_ref[...] = h_norm                   # input to layer l

        sum_ref[...] = jnp.zeros_like(sum_ref)
        sqsum_ref[...] = jnp.zeros_like(sqsum_ref)

    # ---- one GIN layer on one node-row tile ---------------------------------
    row = pl.multiple_of(i * tile, tile)
    adj_t = adj_ref[...].astype(jnp.float32)        # (tile, n_pad), bf16 -> f32 (exact)
    h_all = h_in_ref[...]                           # (n_pad, P)
    h_self = h_in_ref[pl.ds(row, tile), :]          # (tile, P)

    # GINConv(eps=0): (1+eps)*x_i + sum_{j in N(i)} x_j
    agg = jnp.dot(adj_t, h_all, preferred_element_type=jnp.float32) + h_self
    z = jnp.dot(agg, w1_ref[0], preferred_element_type=jnp.float32) + b1_ref[0]
    z = jnp.maximum(z, 0.0)
    h = jnp.dot(z, w2_ref[0], preferred_element_type=jnp.float32) + b2_ref[0]
    h = jnp.maximum(h, 0.0)                         # pre-BatchNorm layer output

    dst = pl.multiple_of(l * n_pad + row, tile)
    xn_ref[pl.ds(dst, tile), :] = h                 # full 128-lane store

    # single-pass BatchNorm statistics, masked to real (non-padded) nodes
    ridx = jax.lax.broadcasted_iota(jnp.int32, (tile, 1), 0) + row
    valid = (ridx < n_real).astype(jnp.float32)
    hm = h * valid
    sum_ref[...] += jnp.sum(hm, axis=0, keepdims=True)
    sqsum_ref[...] += jnp.sum(hm * hm, axis=0, keepdims=True)

    # ---- finalize: last layer, last node tile -------------------------------
    @pl.when(jnp.logical_and(l == num_layers - 1, i == num_tiles - 1))
    def _():
        # BatchNorm of the last layer
        mean = sum_ref[...] * inv_n
        var = sqsum_ref[...] * inv_n - mean * mean
        inv_std = jax.lax.rsqrt(var + eps)
        off = (num_layers - 1) * n_pad
        xn_ref[pl.ds(off, n_pad), :] = (
            (xn_ref[pl.ds(off, n_pad), :] - mean) * inv_std)

        xn_layers = [xn_ref[pl.ds(l2 * n_pad, n_pad), :] for l2 in range(num_layers)]

        # group head: logits^T[j, n] = sum_l (wg_l^T @ x_n_l^T)[j, n] + bg[j]
        logits = jnp.zeros((k_pad, n_pad), jnp.float32) + bg_ref[...]
        for l2 in range(num_layers):
            wgt_l = wgt_ref[pl.ds(l2 * k_pad, k_pad), :]      # (k_pad, P)
            logits += jax.lax.dot_general(
                wgt_l, xn_layers[l2], (((1,), (1,)), ((), ())),
                preferred_element_type=jnp.float32)            # (k_pad, n_pad)

        g_valid = jax.lax.broadcasted_iota(jnp.int32, (k_pad, n_pad), 0) < num_groups
        logits = jnp.where(g_valid, logits, -1e30)
        m = jnp.max(logits, axis=0, keepdims=True)
        e = jnp.exp(logits - m)
        denom = jnp.sum(e, axis=0, keepdims=True)
        s_t = e * pl.reciprocal(denom, approx=True)            # (k_pad, n_pad) softmax over groups

        # batched masked pooling: one (B*k_pad, n_pad) @ (n_pad, P) matmul per layer
        st_rep = jnp.dot(rep_ref[...], s_t, preferred_element_type=jnp.float32)
        sm = mask_rep_ref[...] * st_rep                        # (B*k_pad, n_pad)
        bkp = num_graphs * k_pad
        for l2 in range(num_layers):
            xg_ref[pl.ds(l2 * bkp, bkp), :] = jnp.dot(
                sm, xn_layers[l2], preferred_element_type=jnp.float32)


# ---------------------------------------------------------------------------
# simclr.forward wrapper
# ---------------------------------------------------------------------------
def simclr_forward(params, x, edge_index, batch, num_graphs):
    n, f = x.shape
    layers = params["layers"]
    num_layers = len(layers)
    hidden = layers[0]["w2"].shape[1]
    k = params["wg"].shape[1]

    P = max(128, _round_up(max(f, hidden), 128))      # lane-dense feature width
    k_pad = _round_up(max(k, 8), 8)
    if n <= 256:
        n_pad = _round_up(n, 16)
        tile = n_pad
    else:
        tile = 256
        n_pad = _round_up(n, tile)
    num_tiles = n_pad // tile
    bkp = num_graphs * k_pad

    # dense adjacency A[dst, src]; stored bf16 (exact for small edge counts)
    adj = jnp.zeros((n_pad, n_pad), jnp.float32)
    adj = adj.at[edge_index[1], edge_index[0]].add(1.0).astype(jnp.bfloat16)

    # padded node features
    x_pad = jnp.zeros((n_pad, P), jnp.float32).at[:n, :f].set(x)

    # per-(graph, group-slot) node mask, row index = b*k_pad + j
    batch_pad = jnp.full((n_pad,), -1, jnp.int32).at[:n].set(batch.astype(jnp.int32))
    mask = (batch_pad[None, :] == jnp.arange(num_graphs, dtype=jnp.int32)[:, None]
            ).astype(jnp.float32)                      # (B, n_pad)
    mask_rep = jnp.repeat(mask, k_pad, axis=0)         # (B*k_pad, n_pad)
    rep = jnp.tile(jnp.eye(k_pad, dtype=jnp.float32), (num_graphs, 1))  # (B*k_pad, k_pad)

    # stacked, zero-padded layer weights
    def pad_w(w):
        return jnp.zeros((P, P), jnp.float32).at[:w.shape[0], :w.shape[1]].set(w)

    def pad_b(b):
        return jnp.zeros((1, P), jnp.float32).at[:, :b.shape[1]].set(b)

    w1s = jnp.stack([pad_w(lp["w1"]) for lp in layers])    # (L, P, P)
    b1s = jnp.stack([pad_b(lp["b1"]) for lp in layers])    # (L, 1, P)
    w2s = jnp.stack([pad_w(lp["w2"]) for lp in layers])
    b2s = jnp.stack([pad_b(lp["b2"]) for lp in layers])

    # group head: per-layer slice of wg, transposed and padded to (k_pad, P)
    wgt = jnp.zeros((num_layers * k_pad, P), jnp.float32)
    for l2 in range(num_layers):
        wg_l = params["wg"][l2 * hidden:(l2 + 1) * hidden, :]    # (hidden, k)
        wgt = wgt.at[l2 * k_pad:l2 * k_pad + k, :hidden].set(wg_l.T)
    bg = jnp.zeros((k_pad, 1), jnp.float32).at[:k, 0].set(params["bg"][0])

    kernel = functools.partial(
        _fused_encoder_kernel,
        n_real=n, n_pad=n_pad, tile=tile, num_layers=num_layers,
        num_groups=k, k_pad=k_pad, num_graphs=num_graphs, eps=1e-5)

    xn_pad, xg_pad = pl.pallas_call(
        kernel,
        out_shape=(
            jax.ShapeDtypeStruct((num_layers * n_pad, P), jnp.float32),  # x_n (layer-major)
            jax.ShapeDtypeStruct((num_layers * bkp, P), jnp.float32),    # x_group
        ),
        grid_spec=pltpu.PrefetchScalarGridSpec(
            num_scalar_prefetch=0,
            grid=(num_layers, num_tiles),
            in_specs=[
                pl.BlockSpec((tile, n_pad), lambda l, i: (i, 0)),          # adj row tile (bf16)
                pl.BlockSpec((n_pad, P), lambda l, i: (0, 0)),             # x (resident)
                pl.BlockSpec((1, P, P), lambda l, i: (l, 0, 0)),           # w1[l]
                pl.BlockSpec((1, 1, P), lambda l, i: (l, 0, 0)),           # b1[l]
                pl.BlockSpec((1, P, P), lambda l, i: (l, 0, 0)),           # w2[l]
                pl.BlockSpec((1, 1, P), lambda l, i: (l, 0, 0)),           # b2[l]
                pl.BlockSpec((num_layers * k_pad, P), lambda l, i: (0, 0)),  # wg^T (resident)
                pl.BlockSpec((k_pad, 1), lambda l, i: (0, 0)),             # bg (resident)
                pl.BlockSpec((bkp, n_pad), lambda l, i: (0, 0)),           # graph mask (resident)
                pl.BlockSpec((bkp, k_pad), lambda l, i: (0, 0)),           # group replicator
            ],
            out_specs=[
                pl.BlockSpec((num_layers * n_pad, P), lambda l, i: (0, 0)),  # x_n, VMEM-resident
                pl.BlockSpec((num_layers * bkp, P), lambda l, i: (0, 0)),    # x_group
            ],
            scratch_shapes=[
                pltpu.VMEM((n_pad, P), jnp.float32),   # normalized input of current layer
                pltpu.VMEM((1, P), jnp.float32),       # per-column sum
                pltpu.VMEM((1, P), jnp.float32),       # per-column sum of squares
            ],
        ),
        compiler_params=pltpu.CompilerParams(
            dimension_semantics=("arbitrary", "arbitrary")),
    )(adj, x_pad, w1s, b1s, w2s, b2s, wgt, bg, mask_rep, rep)

    # un-pad / assemble outputs (tiny wrapper-side copies)
    x_n = jnp.concatenate(
        [xn_pad[l2 * n_pad:l2 * n_pad + n, :hidden] for l2 in range(num_layers)],
        axis=1)                                                          # (N, hidden*L)
    xg = xg_pad.reshape(num_layers, num_graphs, k_pad, P)
    x_group = jnp.concatenate(
        [xg[l2, :, :k, :hidden] for l2 in range(num_layers)], axis=-1)   # (B, k, hidden*L)
    return x_group, x_n


# ---------------------------------------------------------------------------
# Pure-JAX reference (same math, no Pallas) for a correctness check
# ---------------------------------------------------------------------------
def reference_forward(params, x, edge_index, batch, num_graphs):
    n = x.shape[0]
    adj = jnp.zeros((n, n), jnp.float32).at[edge_index[1], edge_index[0]].add(1.0)
    hs = []
    h = x
    for lp in params["layers"]:
        agg = adj @ h + h
        z = jnp.maximum(agg @ lp["w1"] + lp["b1"], 0.0)
        z = jnp.maximum(z @ lp["w2"] + lp["b2"], 0.0)
        mean = z.mean(axis=0, keepdims=True)
        var = ((z - mean) ** 2).mean(axis=0, keepdims=True)
        h = (z - mean) * jax.lax.rsqrt(var + 1e-5)
        hs.append(h)
    x_n = jnp.concatenate(hs, axis=1)
    logits = x_n @ params["wg"] + params["bg"]
    s = jax.nn.softmax(logits, axis=-1)
    mask = (batch[None, :] == jnp.arange(num_graphs)[:, None]).astype(jnp.float32)
    x_group = jnp.einsum("bn,nk,nd->bkd", mask, s, x_n)
    return x_group, x_n


# ---------------------------------------------------------------------------
# Parameter init (nn.init.xavier_uniform_ on Linear weights, zero bias)
# ---------------------------------------------------------------------------
def xavier_uniform(key, fan_in, fan_out):
    limit = (6.0 / (fan_in + fan_out)) ** 0.5
    return jax.random.uniform(key, (fan_in, fan_out), jnp.float32, -limit, limit)


def init_params(key, num_features, hidden_dim, num_gc_layers, num_group):
    params = {"layers": []}
    for layer in range(num_gc_layers):
        in_dim = num_features if layer == 0 else hidden_dim
        key, k1, k2 = jax.random.split(key, 3)
        params["layers"].append(
            dict(
                w1=xavier_uniform(k1, in_dim, hidden_dim),
                b1=jnp.zeros((1, hidden_dim), jnp.float32),
                w2=xavier_uniform(k2, hidden_dim, hidden_dim),
                b2=jnp.zeros((1, hidden_dim), jnp.float32),
            )
        )
    emb_dim = hidden_dim * num_gc_layers
    key, kg = jax.random.split(key)
    params["wg"] = xavier_uniform(kg, emb_dim, num_group)
    params["bg"] = jnp.zeros((1, num_group), jnp.float32)
    return params


if __name__ == "__main__":
    # small, deterministic config (mirrors args.*)
    NUM_FEATURES = 8      # args.dataset_num_features
    HIDDEN_DIM = 32       # args.hidden_dim
    NUM_GC_LAYERS = 3     # args.num_gc_layers
    NUM_GROUP = 4         # args.num_group
    NUM_GRAPHS = 2
    NODES_PER_GRAPH = 8
    N = NUM_GRAPHS * NODES_PER_GRAPH

    key = jax.random.PRNGKey(0)
    key, kx, kp = jax.random.split(key, 3)

    x = jax.random.normal(kx, (N, NUM_FEATURES), jnp.float32)
    batch = jnp.repeat(jnp.arange(NUM_GRAPHS, dtype=jnp.int32), NODES_PER_GRAPH)

    # bidirectional ring within each graph
    src, dst = [], []
    for g in range(NUM_GRAPHS):
        off = g * NODES_PER_GRAPH
        for i in range(NODES_PER_GRAPH):
            a, b = off + i, off + (i + 1) % NODES_PER_GRAPH
            src += [a, b]
            dst += [b, a]
    edge_index = jnp.array([src, dst], dtype=jnp.int32)  # [2, E]

    params = init_params(kp, NUM_FEATURES, HIDDEN_DIM, NUM_GC_LAYERS, NUM_GROUP)

    fwd = jax.jit(lambda p, xx, ei, bb: simclr_forward(p, xx, ei, bb, NUM_GRAPHS))
    x_group, x_n = fwd(params, x, edge_index, batch)
    jax.block_until_ready((x_group, x_n))

    assert x_group.shape == (NUM_GRAPHS, NUM_GROUP, HIDDEN_DIM * NUM_GC_LAYERS)
    assert x_n.shape == (N, HIDDEN_DIM * NUM_GC_LAYERS)

    # correctness check against a pure-JAX reference (loose: approx reciprocal,
    # single-pass variance, MXU precision)
    with jax.default_matmul_precision("float32"):
        ref_group, ref_n = reference_forward(params, x, edge_index, batch, NUM_GRAPHS)
    assert jnp.allclose(x_n, ref_n, atol=3e-2, rtol=3e-2), "x_n mismatch vs reference"
    assert jnp.allclose(x_group, ref_group, atol=3e-2, rtol=3e-2), "x_group mismatch vs reference"

    print("KERNEL_OK")
</pallas_src>

<mosaic_0001>
module attributes {stable_mosaic.version = 11 : i64} {
  func.func private @main(%arg0: i32) attributes {dimension_semantics = [#tpu.dimension_semantics<core_parallel>], iteration_bounds = array<i64: 2>, tpu.core_type = #tpu.core_type<sc_scalar_subcore>, window_params = []} {
    return
  }
}

module attributes {stable_mosaic.version = 11 : i64} {
  func.func private @main(%arg0: i32) attributes {dimension_semantics = [#tpu.dimension_semantics<core_parallel>], iteration_bounds = array<i64: 2>, tpu.core_type = #tpu.core_type<sc_scalar_subcore>, window_params = []} {
    return
  }
}

module attributes {stable_mosaic.version = 11 : i64} {
  func.func @_fused_encoder_kernel(%arg0: i32, %arg1: i32, %arg2: memref<16x16xbf16, #tpu.memory_space<vmem>>, %arg3: memref<16x128xf32, #tpu.memory_space<vmem>>, %arg4: memref<1x128x128xf32, #tpu.memory_space<vmem>>, %arg5: memref<1x1x128xf32, #tpu.memory_space<vmem>>, %arg6: memref<1x128x128xf32, #tpu.memory_space<vmem>>, %arg7: memref<1x1x128xf32, #tpu.memory_space<vmem>>, %arg8: memref<24x128xf32, #tpu.memory_space<vmem>>, %arg9: memref<8x1xf32, #tpu.memory_space<vmem>>, %arg10: memref<16x16xf32, #tpu.memory_space<vmem>>, %arg11: memref<16x8xf32, #tpu.memory_space<vmem>>, %arg12: memref<48x128xf32, #tpu.memory_space<vmem>>, %arg13: memref<48x128xf32, #tpu.memory_space<vmem>>, %arg14: memref<16x128xf32, #tpu.memory_space<vmem>>, %arg15: memref<1x128xf32, #tpu.memory_space<vmem>>, %arg16: memref<1x128xf32, #tpu.memory_space<vmem>>) attributes {dimension_semantics = [#tpu.dimension_semantics<arbitrary>, #tpu.dimension_semantics<arbitrary>], iteration_bounds = array<i64: 3, 1>, scalar_prefetch = 0 : i64, scratch_operands = 3 : i64, tpu.core_type = #tpu.core_type<tc>, window_params = [{transform_indices = @transform_0, window_bounds = array<i64: 16, 16>}, {pipeline_mode = #tpu.pipeline_mode<synchronous>, transform_indices = @transform_1, window_bounds = array<i64: 16, 128>}, {transform_indices = @transform_2, window_bounds = array<i64: 1, 128, 128>}, {transform_indices = @transform_3, window_bounds = array<i64: 1, 1, 128>}, {transform_indices = @transform_4, window_bounds = array<i64: 1, 128, 128>}, {transform_indices = @transform_5, window_bounds = array<i64: 1, 1, 128>}, {pipeline_mode = #tpu.pipeline_mode<synchronous>, transform_indices = @transform_6, window_bounds = array<i64: 24, 128>}, {pipeline_mode = #tpu.pipeline_mode<synchronous>, transform_indices = @transform_7, window_bounds = array<i64: 8, 1>}, {pipeline_mode = #tpu.pipeline_mode<synchronous>, transform_indices = @transform_8, window_bounds = array<i64: 16, 16>}, {pipeline_mode = #tpu.pipeline_mode<synchronous>, transform_indices = @transform_9, window_bounds = array<i64: 16, 8>}, {pipeline_mode = #tpu.pipeline_mode<synchronous>, transform_indices = @transform_10, window_bounds = array<i64: 48, 128>}, {pipeline_mode = #tpu.pipeline_mode<synchronous>, transform_indices = @transform_11, window_bounds = array<i64: 48, 128>}]} {
    %c0_i32 = arith.constant 0 : i32
    %0 = arith.cmpi eq, %arg1, %c0_i32 : i32
    %1 = arith.extui %0 : i1 to i32
    %c0_i32_0 = arith.constant 0 : i32
    %2 = arith.cmpi ne, %1, %c0_i32_0 : i32
    scf.if %2 {
      %c0_i32_36 = arith.constant 0 : i32
      %60 = arith.cmpi eq, %arg0, %c0_i32_36 : i32
      %61 = arith.extui %60 : i1 to i32
      %c0_i32_37 = arith.constant 0 : i32
      %62 = arith.cmpi ne, %61, %c0_i32_37 : i32
      scf.if %62 {
        %c0_46 = arith.constant 0 : index
        %c0_47 = arith.constant 0 : index
        %70 = vector.load %arg3[%c0_46, %c0_47] : memref<16x128xf32, #tpu.memory_space<vmem>>, vector<16x128xf32>
        %c0_48 = arith.constant 0 : index
        %c0_49 = arith.constant 0 : index
        %71 = vector.load %arg14[%c0_48, %c0_49] : memref<16x128xf32, #tpu.memory_space<vmem>>, vector<16x128xf32>
        tpu.vector_store %arg14[%c0_48, %c0_49], %70 {strides = array<i32>} : memref<16x128xf32, #tpu.memory_space<vmem>>, vector<16x128xf32>,
      } else {
      }
      %c0_i32_38 = arith.constant 0 : i32
      %63 = arith.cmpi sgt, %arg0, %c0_i32_38 : i32
      %64 = arith.extui %63 : i1 to i32
      %c0_i32_39 = arith.constant 0 : i32
      %65 = arith.cmpi ne, %64, %c0_i32_39 : i32
      scf.if %65 {
        %c0_46 = arith.constant 0 : index
        %c0_47 = arith.constant 0 : index
        %70 = vector.load %arg15[%c0_46, %c0_47] : memref<1x128xf32, #tpu.memory_space<vmem>>, vector<1x128xf32>
        %cst_48 = arith.constant 6.250000e-02 : f32
        %71 = vector.broadcast %cst_48 : f32 to vector<1x128xf32>
        %72 = arith.mulf %70, %71 : vector<1x128xf32>
        %c0_49 = arith.constant 0 : index
        %c0_50 = arith.constant 0 : index
        %73 = vector.load %arg16[%c0_49, %c0_50] : memref<1x128xf32, #tpu.memory_space<vmem>>, vector<1x128xf32>
        %cst_51 = arith.constant 6.250000e-02 : f32
        %74 = vector.broadcast %cst_51 : f32 to vector<1x128xf32>
        %75 = arith.mulf %73, %74 : vector<1x128xf32>
        %76 = arith.mulf %72, %72 : vector<1x128xf32>
        %77 = arith.subf %75, %76 : vector<1x128xf32>
        %cst_52 = arith.constant 9.99999974E-6 : f32
        %78 = vector.broadcast %cst_52 : f32 to vector<1x128xf32>
        %79 = arith.addf %77, %78 : vector<1x128xf32>
        %80 = math.rsqrt %79 : vector<1x128xf32>
        %c1_i32 = arith.constant 1 : i32
        %81 = arith.subi %arg0, %c1_i32 : i32
        %c16_i32_53 = arith.constant 16 : i32
        %82 = arith.muli %81, %c16_i32_53 : i32
        %83 = tpu.assume_multiple %82, 16 : i32
        %84 = arith.index_cast %83 : i32 to index
        %c0_54 = arith.constant 0 : index
        %85 = vector.load %arg12[%84, %c0_54] : memref<48x128xf32, #tpu.memory_space<vmem>>, vector<16x128xf32>
        %86 = vector.broadcast %72 : vector<1x128xf32> to vector<16x128xf32>
        %87 = arith.subf %85, %86 : vector<16x128xf32>
        %88 = vector.broadcast %80 : vector<1x128xf32> to vector<16x128xf32>
        %89 = arith.mulf %87, %88 : vector<16x128xf32>
        %90 = arith.index_cast %83 : i32 to index
        %c0_55 = arith.constant 0 : index
        %91 = vector.load %arg12[%90, %c0_55] : memref<48x128xf32, #tpu.memory_space<vmem>>, vector<16x128xf32>
        tpu.vector_store %arg12[%90, %c0_55], %89 {strides = array<i32>} : memref<48x128xf32, #tpu.memory_space<vmem>>, vector<16x128xf32>,
        %c0_56 = arith.constant 0 : index
        %c0_57 = arith.constant 0 : index
        %92 = vector.load %arg14[%c0_56, %c0_57] : memref<16x128xf32, #tpu.memory_space<vmem>>, vector<16x128xf32>
        tpu.vector_store %arg14[%c0_56, %c0_57], %89 {strides = array<i32>} : memref<16x128xf32, #tpu.memory_space<vmem>>, vector<16x128xf32>,
      } else {
      }
      %cst_40 = arith.constant 0.000000e+00 : f32
      %66 = vector.broadcast %cst_40 : f32 to vector<1x128xf32>
      %c0_41 = arith.constant 0 : index
      %c0_42 = arith.constant 0 : index
      %67 = vector.load %arg15[%c0_41, %c0_42] : memref<1x128xf32, #tpu.memory_space<vmem>>, vector<1x128xf32>
      tpu.vector_store %arg15[%c0_41, %c0_42], %66 {strides = array<i32>} : memref<1x128xf32, #tpu.memory_space<vmem>>, vector<1x128xf32>,
      %cst_43 = arith.constant 0.000000e+00 : f32
      %68 = vector.broadcast %cst_43 : f32 to vector<1x128xf32>
      %c0_44 = arith.constant 0 : index
      %c0_45 = arith.constant 0 : index
      %69 = vector.load %arg16[%c0_44, %c0_45] : memref<1x128xf32, #tpu.memory_space<vmem>>, vector<1x128xf32>
      tpu.vector_store %arg16[%c0_44, %c0_45], %68 {strides = array<i32>} : memref<1x128xf32, #tpu.memory_space<vmem>>, vector<1x128xf32>,
    } else {
    }
    %c16_i32 = arith.constant 16 : i32
    %3 = arith.muli %arg1, %c16_i32 : i32
    %4 = tpu.assume_multiple %3, 16 : i32
    %c0 = arith.constant 0 : index
    %c0_1 = arith.constant 0 : index
    %5 = vector.load %arg2[%c0, %c0_1] : memref<16x16xbf16, #tpu.memory_space<vmem>>, vector<16x16xbf16>
    %6 = arith.extf %5 : vector<16x16xbf16> to vector<16x16xf32>
    %c0_2 = arith.constant 0 : index
    %c0_3 = arith.constant 0 : index
    %7 = vector.load %arg14[%c0_2, %c0_3] : memref<16x128xf32, #tpu.memory_space<vmem>>, vector<16x128xf32>
    %8 = arith.index_cast %4 : i32 to index
    %c0_4 = arith.constant 0 : index
    %9 = vector.load %arg14[%8, %c0_4] : memref<16x128xf32, #tpu.memory_space<vmem>>, vector<16x128xf32>
    %cst = arith.constant dense<0.000000e+00> : vector<16x128xf32>
    %10 = tpu.matmul %6, %7, %cst {dimension_numbers = #tpu.dot_dimension_numbers<[1], [0], [0], [1], [0, 0, 1, 1], [], []>} : vector<16x16xf32>, vector<16x128xf32>, vector<16x128xf32> -> vector<16x128xf32>
    %11 = arith.addf %10, %9 : vector<16x128xf32>
    %c0_5 = arith.constant 0 : index
    %c0_6 = arith.constant 0 : index
    %c0_7 = arith.constant 0 : index
    %12 = vector.load %arg4[%c0_5, %c0_6, %c0_7] : memref<1x128x128xf32, #tpu.memory_space<vmem>>, vector<1x128x128xf32>
    %13 = vector.shape_cast %12 : vector<1x128x128xf32> to vector<128x128xf32>
    %cst_8 = arith.constant dense<0.000000e+00> : vector<16x128xf32>
    %14 = tpu.matmul %11, %13, %cst_8 {dimension_numbers = #tpu.dot_dimension_numbers<[1], [0], [0], [1], [0, 0, 1, 1], [], []>} : vector<16x128xf32>, vector<128x128xf32>, vector<16x128xf32> -> vector<16x128xf32>
    %c0_9 = arith.constant 0 : index
    %c0_10 = arith.constant 0 : index
    %c0_11 = arith.constant 0 : index
    %15 = vector.load %arg5[%c0_9, %c0_10, %c0_11] : memref<1x1x128xf32, #tpu.memory_space<vmem>>, vector<1x1x128xf32>
    %16 = vector.shape_cast %15 : vector<1x1x128xf32> to vector<1x128xf32>
    %17 = vector.broadcast %16 : vector<1x128xf32> to vector<16x128xf32>
    %18 = arith.addf %14, %17 : vector<16x128xf32>
    %cst_12 = arith.constant 0.000000e+00 : f32
    %19 = vector.broadcast %cst_12 : f32 to vector<16x128xf32>
    %20 = arith.maximumf %18, %19 : vector<16x128xf32>
    %c0_13 = arith.constant 0 : index
    %c0_14 = arith.constant 0 : index
    %c0_15 = arith.constant 0 : index
    %21 = vector.load %arg6[%c0_13, %c0_14, %c0_15] : memref<1x128x128xf32, #tpu.memory_space<vmem>>, vector<1x128x128xf32>
    %22 = vector.shape_cast %21 : vector<1x128x128xf32> to vector<128x128xf32>
    %cst_16 = arith.constant dense<0.000000e+00> : vector<16x128xf32>
    %23 = tpu.matmul %20, %22, %cst_16 {dimension_numbers = #tpu.dot_dimension_numbers<[1], [0], [0], [1], [0, 0, 1, 1], [], []>} : vector<16x128xf32>, vector<128x128xf32>, vector<16x128xf32> -> vector<16x128xf32>
    %c0_17 = arith.constant 0 : index
    %c0_18 = arith.constant 0 : index
    %c0_19 = arith.constant 0 : index
    %24 = vector.load %arg7[%c0_17, %c0_18, %c0_19] : memref<1x1x128xf32, #tpu.memory_space<vmem>>, vector<1x1x128xf32>
    %25 = vector.shape_cast %24 : vector<1x1x128xf32> to vector<1x128xf32>
    %26 = vector.broadcast %25 : vector<1x128xf32> to vector<16x128xf32>
    %27 = arith.addf %23, %26 : vector<16x128xf32>
    %cst_20 = arith.constant 0.000000e+00 : f32
    %28 = vector.broadcast %cst_20 : f32 to vector<16x128xf32>
    %29 = arith.maximumf %27, %28 : vector<16x128xf32>
    %c16_i32_21 = arith.constant 16 : i32
    %30 = arith.muli %arg0, %c16_i32_21 : i32
    %31 = arith.addi %30, %4 : i32
    %32 = tpu.assume_multiple %31, 16 : i32
    %33 = arith.index_cast %32 : i32 to index
    %c0_22 = arith.constant 0 : index
    %34 = vector.load %arg12[%33, %c0_22] : memref<48x128xf32, #tpu.memory_space<vmem>>, vector<16x128xf32>
    tpu.vector_store %arg12[%33, %c0_22], %29 {strides = array<i32>} : memref<48x128xf32, #tpu.memory_space<vmem>>, vector<16x128xf32>,
    %35 = tpu.iota {dimensions = array<i32: 0>} : vector<16x1xi32>
    %36 = vector.broadcast %4 : i32 to vector<16x1xi32>
    %37 = arith.addi %35, %36 : vector<16x1xi32>
    %c16_i32_23 = arith.constant 16 : i32
    %38 = vector.broadcast %c16_i32_23 : i32 to vector<16x1xi32>
    %39 = arith.cmpi slt, %37, %38 : vector<16x1xi32>
    %40 = arith.extui %39 : vector<16x1xi1> to vector<16x1xi32>
    %41 = arith.sitofp %40 : vector<16x1xi32> to vector<16x1xf32>
    %42 = vector.broadcast %41 : vector<16x1xf32> to vector<16x128xf32>
    %43 = arith.mulf %29, %42 : vector<16x128xf32>
    %c0_24 = arith.constant 0 : index
    %c0_25 = arith.constant 0 : index
    %44 = vector.load %arg15[%c0_24, %c0_25] : memref<1x128xf32, #tpu.memory_space<vmem>>, vector<1x128xf32>
    %cst_26 = arith.constant dense<0.000000e+00> : vector<128xf32>
    %45 = vector.multi_reduction <add>, %43, %cst_26 [0] : vector<16x128xf32> to vector<128xf32>
    %46 = vector.shape_cast %45 : vector<128xf32> to vector<1x128xf32>
    %47 = arith.addf %44, %46 : vector<1x128xf32>
    %c0_27 = arith.constant 0 : index
    %c0_28 = arith.constant 0 : index
    %48 = vector.load %arg15[%c0_27, %c0_28] : memref<1x128xf32, #tpu.memory_space<vmem>>, vector<1x128xf32>
    tpu.vector_store %arg15[%c0_27, %c0_28], %47 {strides = array<i32>} : memref<1x128xf32, #tpu.memory_space<vmem>>, vector<1x128xf32>,
    %c0_29 = arith.constant 0 : index
    %c0_30 = arith.constant 0 : index
    %49 = vector.load %arg16[%c0_29, %c0_30] : memref<1x128xf32, #tpu.memory_space<vmem>>, vector<1x128xf32>
    %50 = arith.mulf %43, %43 : vector<16x128xf32>
    %cst_31 = arith.constant dense<0.000000e+00> : vector<128xf32>
    %51 = vector.multi_reduction <add>, %50, %cst_31 [0] : vector<16x128xf32> to vector<128xf32>
    %52 = vector.shape_cast %51 : vector<128xf32> to vector<1x128xf32>
    %53 = arith.addf %49, %52 : vector<1x128xf32>
    %c0_32 = arith.constant 0 : index
    %c0_33 = arith.constant 0 : index
    %54 = vector.load %arg16[%c0_32, %c0_33] : memref<1x128xf32, #tpu.memory_space<vmem>>, vector<1x128xf32>
    tpu.vector_store %arg16[%c0_32, %c0_33], %53 {strides = array<i32>} : memref<1x128xf32, #tpu.memory_space<vmem>>, vector<1x128xf32>,
    %c2_i32 = arith.constant 2 : i32
    %55 = arith.cmpi eq, %arg0, %c2_i32 : i32
    %c0_i32_34 = arith.constant 0 : i32
    %56 = arith.cmpi eq, %arg1, %c0_i32_34 : i32
    %57 = arith.andi %55, %56 : i1
    %58 = arith.extui %57 : i1 to i32
    %c0_i32_35 = arith.constant 0 : i32
    %59 = arith.cmpi ne, %58, %c0_i32_35 : i32
    scf.if %59 {
      %c0_36 = arith.constant 0 : index
      %c0_37 = arith.constant 0 : index
      %60 = vector.load %arg15[%c0_36, %c0_37] : memref<1x128xf32, #tpu.memory_space<vmem>>, vector<1x128xf32>
      %cst_38 = arith.constant 6.250000e-02 : f32
      %61 = vector.broadcast %cst_38 : f32 to vector<1x128xf32>
      %62 = arith.mulf %60, %61 : vector<1x128xf32>
      %c0_39 = arith.constant 0 : index
      %c0_40 = arith.constant 0 : index
      %63 = vector.load %arg16[%c0_39, %c0_40] : memref<1x128xf32, #tpu.memory_space<vmem>>, vector<1x128xf32>
      %cst_41 = arith.constant 6.250000e-02 : f32
      %64 = vector.broadcast %cst_41 : f32 to vector<1x128xf32>
      %65 = arith.mulf %63, %64 : vector<1x128xf32>
      %66 = arith.mulf %62, %62 : vector<1x128xf32>
      %67 = arith.subf %65, %66 : vector<1x128xf32>
      %cst_42 = arith.constant 9.99999974E-6 : f32
      %68 = vector.broadcast %cst_42 : f32 to vector<1x128xf32>
      %69 = arith.addf %67, %68 : vector<1x128xf32>
      %70 = math.rsqrt %69 : vector<1x128xf32>
      %c32 = arith.constant 32 : index
      %c0_43 = arith.constant 0 : index
      %71 = vector.load %arg12[%c32, %c0_43] : memref<48x128xf32, #tpu.memory_space<vmem>>, vector<16x128xf32>
      %72 = vector.broadcast %62 : vector<1x128xf32> to vector<16x128xf32>
      %73 = arith.subf %71, %72 : vector<16x128xf32>
      %74 = vector.broadcast %70 : vector<1x128xf32> to vector<16x128xf32>
      %75 = arith.mulf %73, %74 : vector<16x128xf32>
      %c32_44 = arith.constant 32 : index
      %c0_45 = arith.constant 0 : index
      %76 = vector.load %arg12[%c32_44, %c0_45] : memref<48x128xf32, #tpu.memory_space<vmem>>, vector<16x128xf32>
      tpu.vector_store %arg12[%c32_44, %c0_45], %75 {strides = array<i32>} : memref<48x128xf32, #tpu.memory_space<vmem>>, vector<16x128xf32>,
      %c0_46 = arith.constant 0 : index
      %c0_47 = arith.constant 0 : index
      %77 = vector.load %arg12[%c0_46, %c0_47] : memref<48x128xf32, #tpu.memory_space<vmem>>, vector<16x128xf32>
      %c16 = arith.constant 16 : index
      %c0_48 = arith.constant 0 : index
      %78 = vector.load %arg12[%c16, %c0_48] : memref<48x128xf32, #tpu.memory_space<vmem>>, vector<16x128xf32>
      %c32_49 = arith.constant 32 : index
      %c0_50 = arith.constant 0 : index
      %79 = vector.load %arg12[%c32_49, %c0_50] : memref<48x128xf32, #tpu.memory_space<vmem>>, vector<16x128xf32>
      %cst_51 = arith.constant 0.000000e+00 : f32
      %80 = vector.broadcast %cst_51 : f32 to vector<8x16xf32>
      %c0_52 = arith.constant 0 : index
      %c0_53 = arith.constant 0 : index
      %81 = vector.load %arg9[%c0_52, %c0_53] : memref<8x1xf32, #tpu.memory_space<vmem>>, vector<8x1xf32>
      %82 = vector.broadcast %81 : vector<8x1xf32> to vector<8x16xf32>
      %83 = arith.addf %80, %82 : vector<8x16xf32>
      %c0_54 = arith.constant 0 : index
      %c0_55 = arith.constant 0 : index
      %84 = vector.load %arg8[%c0_54, %c0_55] : memref<24x128xf32, #tpu.memory_space<vmem>>, vector<8x128xf32>
      %cst_56 = arith.constant dense<0.000000e+00> : vector<8x16xf32>
      %85 = tpu.matmul %84, %77, %cst_56 {dimension_numbers = #tpu.dot_dimension_numbers<[1], [1], [0], [0], [0, 0, 1, 0], [], []>} : vector<8x128xf32>, vector<16x128xf32>, vector<8x16xf32> -> vector<8x16xf32>
      %86 = arith.addf %83, %85 : vector<8x16xf32>
      %c8 = arith.constant 8 : index
      %c0_57 = arith.constant 0 : index
      %87 = vector.load %arg8[%c8, %c0_57] : memref<24x128xf32, #tpu.memory_space<vmem>>, vector<8x128xf32>
      %cst_58 = arith.constant dense<0.000000e+00> : vector<8x16xf32>
      %88 = tpu.matmul %87, %78, %cst_58 {dimension_numbers = #tpu.dot_dimension_numbers<[1], [1], [0], [0], [0, 0, 1, 0], [], []>} : vector<8x128xf32>, vector<16x128xf32>, vector<8x16xf32> -> vector<8x16xf32>
      %89 = arith.addf %86, %88 : vector<8x16xf32>
      %c16_59 = arith.constant 16 : index
      %c0_60 = arith.constant 0 : index
      %90 = vector.load %arg8[%c16_59, %c0_60] : memref<24x128xf32, #tpu.memory_space<vmem>>, vector<8x128xf32>
      %cst_61 = arith.constant dense<0.000000e+00> : vector<8x16xf32>
      %91 = tpu.matmul %90, %79, %cst_61 {dimension_numbers = #tpu.dot_dimension_numbers<[1], [1], [0], [0], [0, 0, 1, 0], [], []>} : vector<8x128xf32>, vector<16x128xf32>, vector<8x16xf32> -> vector<8x16xf32>
      %92 = arith.addf %89, %91 : vector<8x16xf32>
      %93 = tpu.iota {dimensions = array<i32: 0>} : vector<8x16xi32>
      %c4_i32 = arith.constant 4 : i32
      %94 = vector.broadcast %c4_i32 : i32 to vector<8x16xi32>
      %95 = arith.cmpi slt, %93, %94 : vector<8x16xi32>
      %cst_62 = arith.constant -1.000000e+30 : f32
      %96 = vector.broadcast %cst_62 : f32 to vector<8x16xf32>
      %97 = arith.select %95, %92, %96 : vector<8x16xi1>, vector<8x16xf32>
      %cst_63 = arith.constant dense<0xFF800000> : vector<16xf32>
      %98 = vector.multi_reduction <maximumf>, %97, %cst_63 [0] : vector<8x16xf32> to vector<16xf32>
      %99 = vector.shape_cast %98 : vector<16xf32> to vector<1x16xf32>
      %100 = vector.broadcast %99 : vector<1x16xf32> to vector<8x16xf32>
      %101 = arith.subf %97, %100 : vector<8x16xf32>
      %102 = math.exp %101 : vector<8x16xf32>
      %cst_64 = arith.constant dense<0.000000e+00> : vector<16xf32>
      %103 = vector.multi_reduction <add>, %102, %cst_64 [0] : vector<8x16xf32> to vector<16xf32>
      %104 = vector.shape_cast %103 : vector<16xf32> to vector<1x16xf32>
      %105 = tpu.reciprocal %104 {approx = true} : vector<1x16xf32> -> vector<1x16xf32>
      %106 = vector.broadcast %105 : vector<1x16xf32> to vector<8x16xf32>
      %107 = arith.mulf %102, %106 : vector<8x16xf32>
      %c0_65 = arith.constant 0 : index
      %c0_66 = arith.constant 0 : index
      %108 = vector.load %arg11[%c0_65, %c0_66] : memref<16x8xf32, #tpu.memory_space<vmem>>, vector<16x8xf32>
      %cst_67 = arith.constant dense<0.000000e+00> : vector<16x16xf32>
      %109 = tpu.matmul %108, %107, %cst_67 {dimension_numbers = #tpu.dot_dimension_numbers<[1], [0], [0], [1], [0, 0, 1, 1], [], []>} : vector<16x8xf32>, vector<8x16xf32>, vector<16x16xf32> -> vector<16x16xf32>
      %c0_68 = arith.constant 0 : index
      %c0_69 = arith.constant 0 : index
      %110 = vector.load %arg10[%c0_68, %c0_69] : memref<16x16xf32, #tpu.memory_space<vmem>>, vector<16x16xf32>
      %111 = arith.mulf %110, %109 : vector<16x16xf32>
      %cst_70 = arith.constant dense<0.000000e+00> : vector<16x128xf32>
      %112 = tpu.matmul %111, %77, %cst_70 {dimension_numbers = #tpu.dot_dimension_numbers<[1], [0], [0], [1], [0, 0, 1, 1], [], []>} : vector<16x16xf32>, vector<16x128xf32>, vector<16x128xf32> -> vector<16x128xf32>
      %c0_71 = arith.constant 0 : index
      %c0_72 = arith.constant 0 : index
      %113 = vector.load %arg13[%c0_71, %c0_72] : memref<48x128xf32, #tpu.memory_space<vmem>>, vector<16x128xf32>
      tpu.vector_store %arg13[%c0_71, %c0_72], %112 {strides = array<i32>} : memref<48x128xf32, #tpu.memory_space<vmem>>, vector<16x128xf32>,
      %cst_73 = arith.constant dense<0.000000e+00> : vector<16x128xf32>
      %114 = tpu.matmul %111, %78, %cst_73 {dimension_numbers = #tpu.dot_dimension_numbers<[1], [0], [0], [1], [0, 0, 1, 1], [], []>} : vector<16x16xf32>, vector<16x128xf32>, vector<16x128xf32> -> vector<16x128xf32>
      %c16_74 = arith.constant 16 : index
      %c0_75 = arith.constant 0 : index
      %115 = vector.load %arg13[%c16_74, %c0_75] : memref<48x128xf32, #tpu.memory_space<vmem>>, vector<16x128xf32>
      tpu.vector_store %arg13[%c16_74, %c0_75], %114 {strides = array<i32>} : memref<48x128xf32, #tpu.memory_space<vmem>>, vector<16x128xf32>,
      %cst_76 = arith.constant dense<0.000000e+00> : vector<16x128xf32>
      %116 = tpu.matmul %111, %79, %cst_76 {dimension_numbers = #tpu.dot_dimension_numbers<[1], [0], [0], [1], [0, 0, 1, 1], [], []>} : vector<16x16xf32>, vector<16x128xf32>, vector<16x128xf32> -> vector<16x128xf32>
      %c32_77 = arith.constant 32 : index
      %c0_78 = arith.constant 0 : index
      %117 = vector.load %arg13[%c32_77, %c0_78] : memref<48x128xf32, #tpu.memory_space<vmem>>, vector<16x128xf32>
      tpu.vector_store %arg13[%c32_77, %c0_78], %116 {strides = array<i32>} : memref<48x128xf32, #tpu.memory_space<vmem>>, vector<16x128xf32>,
    } else {
    }
    return
  }
  func.func @transform_0(%arg0: i32, %arg1: i32) -> (i32, i32) {
    %c0_i32 = arith.constant 0 : i32
    %c0_i32_0 = arith.constant 0 : i32
    return %arg1, %c0_i32 : i32, i32
  }
  func.func @transform_1(%arg0: i32, %arg1: i32) -> (i32, i32) {
    %c0_i32 = arith.constant 0 : i32
    %c0_i32_0 = arith.constant 0 : i32
    %c0_i32_1 = arith.constant 0 : i32
    return %c0_i32, %c0_i32_0 : i32, i32
  }
  func.func @transform_2(%arg0: i32, %arg1: i32) -> (i32, i32, i32) {
    %c0_i32 = arith.constant 0 : i32
    %c0_i32_0 = arith.constant 0 : i32
    %c0_i32_1 = arith.constant 0 : i32
    return %arg0, %c0_i32, %c0_i32_0 : i32, i32, i32
  }
  func.func @transform_3(%arg0: i32, %arg1: i32) -> (i32, i32, i32) {
    %c0_i32 = arith.constant 0 : i32
    %c0_i32_0 = arith.constant 0 : i32
    %c0_i32_1 = arith.constant 0 : i32
    return %arg0, %c0_i32, %c0_i32_0 : i32, i32, i32
  }
  func.func @transform_4(%arg0: i32, %arg1: i32) -> (i32, i32, i32) {
    %c0_i32 = arith.constant 0 : i32
    %c0_i32_0 = arith.constant 0 : i32
    %c0_i32_1 = arith.constant 0 : i32
    return %arg0, %c0_i32, %c0_i32_0 : i32, i32, i32
  }
  func.func @transform_5(%arg0: i32, %arg1: i32) -> (i32, i32, i32) {
    %c0_i32 = arith.constant 0 : i32
    %c0_i32_0 = arith.constant 0 : i32
    %c0_i32_1 = arith.constant 0 : i32
    return %arg0, %c0_i32, %c0_i32_0 : i32, i32, i32
  }
  func.func @transform_6(%arg0: i32, %arg1: i32) -> (i32, i32) {
    %c0_i32 = arith.constant 0 : i32
    %c0_i32_0 = arith.constant 0 : i32
    %c0_i32_1 = arith.constant 0 : i32
    return %c0_i32, %c0_i32_0 : i32, i32
  }
  func.func @transform_7(%arg0: i32, %arg1: i32) -> (i32, i32) {
    %c0_i32 = arith.constant 0 : i32
    %c0_i32_0 = arith.constant 0 : i32
    %c0_i32_1 = arith.constant 0 : i32
    return %c0_i32, %c0_i32_0 : i32, i32
  }
  func.func @transform_8(%arg0: i32, %arg1: i32) -> (i32, i32) {
    %c0_i32 = arith.constant 0 : i32
    %c0_i32_0 = arith.constant 0 : i32
    %c0_i32_1 = arith.constant 0 : i32
    return %c0_i32, %c0_i32_0 : i32, i32
  }
  func.func @transform_9(%arg0: i32, %arg1: i32) -> (i32, i32) {
    %c0_i32 = arith.constant 0 : i32
    %c0_i32_0 = arith.constant 0 : i32
    %c0_i32_1 = arith.constant 0 : i32
    return %c0_i32, %c0_i32_0 : i32, i32
  }
  func.func @transform_10(%arg0: i32, %arg1: i32) -> (i32, i32) {
    %c0_i32 = arith.constant 0 : i32
    %c0_i32_0 = arith.constant 0 : i32
    %c0_i32_1 = arith.constant 0 : i32
    return %c0_i32, %c0_i32_0 : i32, i32
  }
  func.func @transform_11(%arg0: i32, %arg1: i32) -> (i32, i32) {
    %c0_i32 = arith.constant 0 : i32
    %c0_i32_0 = arith.constant 0 : i32
    %c0_i32_1 = arith.constant 0 : i32
    return %c0_i32, %c0_i32_0 : i32, i32
  }
}

</mosaic_0001>

<bundles_post_ra>
// kernel: _lambda_.1
= control target key start
LH: loop header
LB: loop body
LE: loop exit
PB: predicated region body
PF: predicated region fallthrough
CT: control target
= control target key end

     0   :  { %s1889_s17 = smov 0   ;;  %s1891_s18 = smov 0   ;;  %s2122_s0 = inlined_call_operand.vmem [shape: bf16[16,16], index: 0, kind: input, shape index: {}]   ;;  %s2123_s1 = inlined_call_operand.vmem [shape: f32[16,128], index: 1, kind: input, shape index: {}]   ;;  %s2124_s2 = inlined_call_operand.vmem [shape: f32[3,128,128], index: 2, kind: input, shape index: {}]   ;;  %s2125_s3 = inlined_call_operand.vmem [shape: f32[3,1,128], index: 3, kind: input, shape index: {}]   ;;  %s2126_s4 = inlined_call_operand.vmem [shape: f32[3,128,128], index: 4, kind: input, shape index: {}]   ;;  %s2127_s5 = inlined_call_operand.vmem [shape: f32[3,1,128], index: 5, kind: input, shape index: {}]   ;;  %s2128_s6 = inlined_call_operand.vmem [shape: f32[24,128], index: 6, kind: input, shape index: {}]   ;;  %s2129_s7 = inlined_call_operand.vmem [shape: f32[8,1], index: 7, kind: input, shape index: {}]   ;;  %s2130_s8 = inlined_call_operand.vmem [shape: f32[16,16], index: 8, kind: input, shape index: {}]   ;;  %s2131_s9 = inlined_call_operand.vmem [shape: f32[16,8], index: 9, kind: input, shape index: {}]   ;;  %s2132_s10 = inlined_call_operand.vmem [shape: f32[48,128], index: 10, kind: output, shape index: {0}]   ;;  %s2133_s11 = inlined_call_operand.vmem [shape: f32[48,128], index: 11, kind: output, shape index: {1}]  }
   0x1   :  { %s1893_s19 = smov 0  }
   0x2 LB: > { %s34_s20 = sadd.s32 1, %s1819_s18  ;;  %p1544_p0 = scmp.ge.s32.totalorder %s1823_s19, 1  ;;  %s1823_s19 = sphi %s1893_s19, %s22_s19   ;;  %s1819_s18 = sphi %s1891_s18, %s2135_s18   ;;  %s1815_s17 = sphi %s1889_s17, %s2134_s17  }
   0x3   : > { %p36_p1 = scmp.ge.s32.totalorder %s34_s20, 3  ;;  %p379_p2 = scmp.lt.s32.totalorder %s1823_s19, 4 }
   0x5   : > { %s2137_s20 = smov (%p36_p1, %s34_s20), 0  ;;  %p380_p3 = pnand %p1544_p0, %p379_p2 }
   0x6   : > { %p436_p4 = scmp.lt.s32.totalorder (!%p380_p3), %s1815_s17, 2  ;;  %p1549_p5 = scmp.ne.s32.totalorder (!%p380_p3), %s1815_s17, 0 }
   0x7   : > { %383 = sbr.rel (%p380_p3) target bundleno = 1377 (0x561), region = 60 }
   0xc   : > { %s1911_s21 = scalar_select %p436_p4, %s1815_s17, 2 }
   0xd   : > { %459 = sbr.rel (%p1549_p5) target bundleno = 20 (0x14), region = 68 }
   0xe   : > { %s1569_s22 = sshll.u32 %s1911_s21, 7  ;;  %s443_s25 = scalar_lea.vmem %s2125_s3, %s1911_s21 }
   0xf   : > { %s1921_s28 = scalar_lea.vmem %s2124_s2, %s1569_s22  ;;  %s1926_s12 = scalar_lea.vmem %s2126_s4, %s1569_s22 }
  0x10   : > { %s451_s15 = scalar_lea.vmem %s2127_s5, %s1911_s21 }
  0x12   : > { %v460_v0 = vld [vmem:[%s2123_s1] sm:$0xff]  ;;  %v461_v1 = vld [vmem:[%s2123_s1 + $0x8] sm:$0xff] }
  0x13   : > { %462 = vst [vmem:[#allocation2] sm:$0xff] %v460_v0  ;;  %463 = vst [vmem:[#allocation2 + $0x8] sm:$0xff] %v461_v1 }
  0x14 PF: > { %p1550_p6 = scmp.le.s32.totalorder %s1815_s17, 0 }
  0x15   : > { %s1551_s22 = sadd.s32 (!%p1550_p6), 4294967295, %s1815_s17 }
  0x16   : > { %467 = sbr.rel (%p1550_p6) target bundleno = 56 (0x38), region = 72  ;;  %s1552_s27 = sshll.u32 (!%p1550_p6), %s1551_s22, 4 }
  0x17   : > { %s478_s13 = scalar_lea.vmem (!%p1550_p6), %s2132_s10, %s1552_s27 }
  0x1b   : > { %v468_v2 = vld [vmem:[#allocation3] sm:$0x1]  ;;  %v470_v3 = vld [vmem:[#allocation4] sm:$0x1]  ;;  %v482_v8 = vlaneseq  ;;  %v479_v13 = vld [vmem:[%s478_s13] sm:$0xff] }
  0x1c   : > { %v469_v4 = vmul.f32 0.0625, %v468_v2  ;;  %v471_v5 = vmul.f32 0.0625, %v470_v3  ;;  %v480_v14 = vld [vmem:[%s478_s13 + $0x8] sm:$0xff] }
  0x1d   : > { %v483_v10 = vshrl.u32 %v482_v8, 7 }
  0x1e   : > { %v472_v6 = vmul.f32 %v469_v4, %v469_v4 }
  0x1f   : > { %v484_v11 = vsub.s32 0, %v483_v10 }
  0x20   : > { %v473_v7 = vsub.f32 %v471_v5, %v472_v6 }
  0x21   : > { %v485_v12 = vrot.slane %v469_v4, %v484_v11 }
  0x22   : > { %v474_v9 = vadd.f32 1e-05, %v473_v7 }
  0x23   : > { %v487_v15 = vsub.f32 %v479_v13, %v485_v12  ;;  %v488_v16 = vsub.f32 %v480_v14, %v485_v12 }
  0x24   : > { %1792 = vrsqrt.f32 %v474_v9 }
  0x31   : > { %v1793_v17 = vpop.eup %1792 }
  0x32   : > { %v493_v18 = vrot.slane %v1793_v17, %v484_v11 }
  0x34   : > { %v495_v19 = vmul.f32 %v493_v18, %v487_v15  ;;  %v496_v20 = vmul.f32 %v493_v18, %v488_v16 }
  0x36   : > { %497 = vst [vmem:[%s478_s13] sm:$0xff] %v495_v19  ;;  %499 = vst [vmem:[#allocation2] sm:$0xff] %v495_v19 }
  0x37   : > { %498 = vst [vmem:[%s478_s13 + $0x8] sm:$0xff] %v496_v20  ;;  %500 = vst [vmem:[#allocation2 + $0x8] sm:$0xff] %v496_v20 }
  0x38 PF: > { %v1573_v23 = vld [vmem:[%s2122_s0] sm:$0xff]   ;;  %vm513_vm0 = vcmask 130048   ;;  %v610_v26 = vld [vmem:[%s1921_s28 + $0x78] sm:$0xff]  ;;  %v609_v27 = vld [vmem:[%s1921_s28 + $0x70] sm:$0xff]  ;;  %v1825_v5 = vmov 0.0   ;;  %v800_v6 = vlaneseq  ;;  %p836_p7 = scmp.eq.s32.totalorder %s1815_s17, 2 }
  0x39   : > { %v1574_v24 = vunpack.c.l.bf16 %v1573_v23  ;;  %v1575_v25 = vunpack.c.h.bf16 %v1573_v23  ;;  %1647 = vmatprep.subr.mxu1 %v610_v26  ;;  %v608_v28 = vld [vmem:[%s1921_s28 + $0x68] sm:$0xff]  ;;  %v607_v29 = vld [vmem:[%s1921_s28 + $0x60] sm:$0xff]  ;;  %v606_v30 = vld [vmem:[%s1921_s28 + $0x58] sm:$0xff]  ;;  %501 = vst [vmem:[#allocation3] sm:$0x1] %v1825_v5  ;;  %vm1827_vm1 = vmmov (%p836_p7), 0  }
  0x3a   : > { %1648 = vmatpush3.msra.mxu1 %v610_v26  ;;  %v605_v31 = vld [vmem:[%s1921_s28 + $0x50] sm:$0xff]  ;;  %v604_v32 = vld [vmem:[%s1921_s28 + $0x48] sm:$0xff]  ;;  %v603_v33 = vld [vmem:[%s1921_s28 + $0x40] sm:$0xff]  ;;  %502 = vst [vmem:[#allocation4] sm:$0x1] %v1825_v5  ;;  %v1996_v7 = vshrl.u32 %v800_v6, 7 }
  0x3b   : > { %1644 = vmatprep.mubr.msk.f32.mxu0 %vm513_vm0, %v1574_v24  ;;  %1649 = vmatprep.subr.mxu1 %v609_v27  ;;  %v602_v34 = vld [vmem:[%s1921_s28 + $0x38] sm:$0xff]  ;;  %v601_v35 = vld [vmem:[%s1921_s28 + $0x30] sm:$0xff]  ;;  %v600_v36 = vld [vmem:[%s1921_s28 + $0x28] sm:$0xff]  ;;  %vm1121_vm2 = vcmask (%p836_p7), 64512  }
  0x3c   : > { %1650 = vmatpush3.msra.mxu1 %v609_v27  ;;  %v599_v37 = vld [vmem:[%s1921_s28 + $0x20] sm:$0xff]  ;;  %v598_v38 = vld [vmem:[%s1921_s28 + $0x18] sm:$0xff]  ;;  %v597_v39 = vld [vmem:[%s1921_s28 + $0x10] sm:$0xff]  ;;  %vm1098_vm3 = vcmp.lt.s32.totalorder (%p836_p7), %v1996_v7, 4 }
  0x3d   : > { %v1946_v22 = vld [vmem:[#allocation2] sm:$0xff]  ;;  %1651 = vmatprep.subr.mxu1 %v608_v28  ;;  %v596_v40 = vld [vmem:[%s1921_s28 + $0x8] sm:$0xff]  ;;  %v710_v42 = vld [vmem:[%s1926_s12 + $0x78] sm:$0xff] }
  0x3e   : > { %v1944_v21 = vld [vmem:[#allocation2 + $0x8] sm:$0xff]  ;;  %1652 = vmatpush3.msra.mxu1 %v608_v28  ;;  %v595_v41 = vld [vmem:[%s1921_s28] sm:$0xff]  ;;  %v709_v43 = vld [vmem:[%s1926_s12 + $0x70] sm:$0xff] }
  0x3f   : > { %1640 = vmatprep.subr.mxu0 %v1944_v21  ;;  %1653 = vmatprep.subr.mxu1 %v607_v29  ;;  %v708_v44 = vld [vmem:[%s1926_s12 + $0x68] sm:$0xff]  ;;  %v707_v45 = vld [vmem:[%s1926_s12 + $0x60] sm:$0xff]  ;;  %v706_v46 = vld [vmem:[%s1926_s12 + $0x58] sm:$0xff] }
  0x40   : > { %1641 = vmatpush3.msra.mxu0 %v1944_v21  ;;  %1654 = vmatpush3.msra.mxu1 %v607_v29  ;;  %v705_v47 = vld [vmem:[%s1926_s12 + $0x50] sm:$0xff]  ;;  %v704_v48 = vld [vmem:[%s1926_s12 + $0x48] sm:$0xff]  ;;  %v703_v49 = vld [vmem:[%s1926_s12 + $0x40] sm:$0xff] }
  0x41   : > { %1642 = vmatprep.subr.mxu0 %v1946_v22  ;;  %1655 = vmatprep.subr.mxu1 %v606_v30  ;;  %v702_v50 = vld [vmem:[%s1926_s12 + $0x38] sm:$0xff]  ;;  %v701_v51 = vld [vmem:[%s1926_s12 + $0x30] sm:$0xff]  ;;  %v700_v52 = vld [vmem:[%s1926_s12 + $0x28] sm:$0xff] }
  0x42   : > { %1643 = vmatpush3.msra.mxu0 %v1946_v22  ;;  %1656 = vmatpush3.msra.mxu1 %v606_v30  ;;  %v699_v53 = vld [vmem:[%s1926_s12 + $0x20] sm:$0xff]  ;;  %v698_v58 = vld [vmem:[%s1926_s12 + $0x18] sm:$0xff]  ;;  %v697_v59 = vld [vmem:[%s1926_s12 + $0x10] sm:$0xff] }
  0x43   : > { %1645 = vmatmul.mubr.msk.f32.vlgmr.msra.gmra.mxu0 %vm513_vm0, %v1575_v25  ;;  %1657 = vmatprep.subr.mxu1 %v605_v31  ;;  %v696_v60 = vld [vmem:[%s1926_s12 + $0x8] sm:$0xff]  ;;  %v695_v61 = vld [vmem:[%s1926_s12] sm:$0xff]  ;;  %v814_v28 = vld [vmem:[#allocation3] sm:$0x1] }
  0x44   : > { %1658 = vmatpush3.msra.mxu1 %v605_v31  ;;  %1682 = vmatprep.subr.mxu0 %v710_v42  ;;  %v1555_v62 = vld [vmem:[%s443_s25] ss:$0 sm:$0xff]  ;;  %s1557_s25 = sshll.u32 %s1815_s17, 4  ;;  %v824_v31 = vld [vmem:[#allocation4] sm:$0x1] }
  0x45   : > { %1659 = vmatprep.subr.mxu1 %v604_v32  ;;  %1683 = vmatpush3.msra.mxu0 %v710_v42  ;;  %v1556_v8 = vld [vmem:[%s451_s15] ss:$0 sm:$0xff]  ;;  %s797_s27 = scalar_lea.vmem %s2132_s10, %s1557_s25 }
  0x46   : > { %1660 = vmatpush3.msra.mxu1 %v604_v32  ;;  %1684 = vmatprep.subr.mxu0 %v709_v43 }
  0x47   : > { %1661 = vmatprep.subr.mxu1 %v603_v33  ;;  %1685 = vmatpush3.msra.mxu0 %v709_v43 }
  0x48   : > { %1662 = vmatpush3.msra.mxu1 %v603_v33  ;;  %1686 = vmatprep.subr.mxu0 %v708_v44 }
  0x49   : > { %1663 = vmatprep.subr.mxu1 %v602_v34  ;;  %1687 = vmatpush3.msra.mxu0 %v708_v44 }
  0x4a   : > { %1664 = vmatpush3.msra.mxu1 %v602_v34  ;;  %1688 = vmatprep.subr.mxu0 %v707_v45 }
  0x4b   : > { %1665 = vmatprep.subr.mxu1 %v601_v35  ;;  %1689 = vmatpush3.msra.mxu0 %v707_v45  ;;  %v875_v45 = vld [vmem:[%s2129_s7] sm:$0xff] (%p836_p7) }
  0x4c   : > { %1666 = vmatpush3.msra.mxu1 %v601_v35  ;;  %1690 = vmatprep.subr.mxu0 %v706_v46 }
  0x4d   : > { %1667 = vmatprep.subr.mxu1 %v600_v36  ;;  %1691 = vmatpush3.msra.mxu0 %v706_v46  ;;  %v1828_v46 = vmov (%p836_p7), 0  }
  0x4e   : > { %1668 = vmatpush3.msra.mxu1 %v600_v36  ;;  %1692 = vmatprep.subr.mxu0 %v705_v47 }
  0x4f   : > { %1669 = vmatprep.subr.mxu1 %v599_v37  ;;  %1693 = vmatpush3.msra.mxu0 %v705_v47  ;;  %v882_v47 = vld [vmem:[%s2128_s6] sm:$0xff] (%p836_p7) }
  0x50   : > { %1670 = vmatpush3.msra.mxu1 %v599_v37  ;;  %1694 = vmatprep.subr.mxu0 %v704_v48  ;;  %v1826_v37 = vmov (%p836_p7), 0.0  }
  0x51   : > { %1671 = vmatprep.subr.mxu1 %v598_v38  ;;  %1695 = vmatpush3.msra.mxu0 %v704_v48 }
  0x52   : > { %1672 = vmatpush3.msra.mxu1 %v598_v38  ;;  %1696 = vmatprep.subr.mxu0 %v703_v49 }
  0x53   : > { %1673 = vmatprep.subr.mxu1 %v597_v39  ;;  %1697 = vmatpush3.msra.mxu0 %v703_v49  ;;  %v954_v49 = vld [vmem:[%s2128_s6 + $0x8] sm:$0xff] (%p836_p7) }
  0x54   : > { %1674 = vmatpush3.msra.mxu1 %v597_v39  ;;  %1698 = vmatprep.subr.mxu0 %v702_v50 }
  0x55   : > { %1675 = vmatprep.subr.mxu1 %v596_v40  ;;  %1699 = vmatpush3.msra.mxu0 %v702_v50 }
  0x56   : > { %1676 = vmatpush3.msra.mxu1 %v596_v40  ;;  %1700 = vmatprep.subr.mxu0 %v701_v51 }
  0x57   : > { %1677 = vmatprep.subr.mxu1 %v595_v41  ;;  %1701 = vmatpush3.msra.mxu0 %v701_v51  ;;  %v854_v51 = vsub.s32 (%p836_p7), 0, %v1996_v7 }
  0x58   : > { %1678 = vmatpush3.msra.mxu1 %v595_v41  ;;  %1702 = vmatprep.subr.mxu0 %v700_v52 }
  0x59   : > { %1703 = vmatpush3.msra.mxu0 %v700_v52  ;;  %1724 = vmatprep.subr.mxu1 (%p836_p7), %v1826_v37 }
  0x5a   : > { %1704 = vmatprep.subr.mxu0 %v699_v53  ;;  %1794 = vset.pattern.permute.xlu0 (%p836_p7), %v1828_v46 }
  0x5b   : > { %1705 = vmatpush3.msra.mxu0 %v699_v53  ;;  %878 = vperm.xlu0 (%p836_p7), %1794, %v875_v45  }
  0x5c   : > { %1706 = vmatprep.subr.mxu0 %v698_v58 }
  0x5d   : > { %1707 = vmatpush3.msra.mxu0 %v698_v58 }
  0x5e   : > { %1708 = vmatprep.subr.mxu0 %v697_v59 }
  0x5f   : > { %1709 = vmatpush3.msra.mxu0 %v697_v59 }
  0x60   : > { %1710 = vmatprep.subr.mxu0 %v696_v60 }
  0x61   : > { %1711 = vmatpush3.msra.mxu0 %v696_v60 }
  0x62   : > { %1712 = vmatprep.subr.mxu0 %v695_v61 }
  0x63   : > { %1713 = vmatpush3.msra.mxu0 %v695_v61  ;;  %v1026_v61 = vld [vmem:[%s2128_s6 + $0x10] sm:$0xff] (%p836_p7) }
  0x64   : > { %1717 = vmatprep.subr.mxu0 (%p836_p7), %v1826_v37 }
 0x103   : > { %v1646_v54 = vpop.f32.mrf.mxu0 }
 0x104   : > { %v592_v57 = vadd.f32 %v1646_v54, %v1944_v21 }
 0x105   : > { %v586_v55 = vpop.f32.mrf.mxu0 }
 0x106   : > { %v587_v56 = vadd.f32 %v586_v55, %v1946_v22 }
 0x108   : > { %1679 = vmatprep.mubr.f32.mxu1 %v587_v56 }
 0x109   : > { %1680 = vmatmul.mubr.f32.vlgmr.msra.gmra.mxu1 %v592_v57 }
 0x10a   : > { %1728 = vmatprep.mubr.msk.f32.mxu1 (%p836_p7), %vm1827_vm1, %v1826_v37 }
 0x1c9   : > { %v1681_v63 = vpop.f32.mrf.mxu1 }
 0x1ca   : > { %v690_v0 = vadd.f32 %v1681_v63, %v1555_v62 }
 0x1cb   : > { %v684_v1 = vpop.f32.mrf.mxu1 }
 0x1cc   : > { %v685_v2 = vadd.f32 %v1555_v62, %v684_v1  ;;  %v694_v4 = vmax.f32 %v690_v0, 0.0  ;;  %v1119_v62 = vld [vmem:[%s2131_s9] sm:$0xff] (%p836_p7) }
 0x1ce   : > { %v693_v3 = vmax.f32 %v685_v2, 0.0 }
 0x1d0   : > { %1714 = vmatprep.mubr.f32.mxu0 %v693_v3  ;;  %v879_v3 = vpop.permute.xlu0 (%p836_p7), %878 }
 0x1d1   : > { %1715 = vmatmul.mubr.f32.vlgmr.msra.gmra.mxu0 %v694_v4 }
 0x1d2   : > { %1721 = vmatprep.mubr.msk.f32.mxu0 (%p836_p7), %vm1827_vm1, %v1826_v37 }
 0x291   : > { %v1716_v9 = vpop.f32.mrf.mxu0 }
 0x292   : > { %v790_v10 = vadd.f32 %v1716_v9, %v1556_v8 }
 0x293   : > { %v784_v11 = vpop.f32.mrf.mxu0 }
 0x294   : > { %v794_v12 = vmax.f32 %v790_v10, 0.0  ;;  %v785_v13 = vadd.f32 %v1556_v8, %v784_v11 }
 0x296   : > { %799 = vst [vmem:[%s797_s27 + $0x8] sm:$0xff] %v794_v12  ;;  %v793_v14 = vmax.f32 %v785_v13, 0.0  ;;  %v826_v15 = vmul.f32 %v794_v12, %v794_v12 }
 0x298   : > { %798 = vst [vmem:[%s797_s27] sm:$0xff] %v793_v14  ;;  %v815_v16 = vadd.f32 %v794_v12, %v793_v14  ;;  %v825_v17 = vmul.f32 %v793_v14, %v793_v14 }
 0x29a   : > { %v816_v18 = vrot.slane %v815_v16, 4  ;;  %v827_v19 = vadd.f32 %v826_v15, %v825_v17 }
 0x29c   : > { %v817_v20 = vadd.f32 %v816_v18, %v815_v16  ;;  %v828_v21 = vrot.slane %v827_v19, 4 }
 0x29e   : > { %v818_v22 = vrot.slane %v817_v20, 2  ;;  %v829_v23 = vadd.f32 %v828_v21, %v827_v19 }
 0x29f   : > { %v2013_v35 = vld [vmem:[%s2132_s10 + $0x8] sm:$0xff] (%p836_p7)  ;;  %v872_v36 = vld [vmem:[%s2132_s10 + $0x18] sm:$0xff] (%p836_p7)  ;;  %v2022_v41 = vld [vmem:[%s2132_s10] sm:$0xff] (%p836_p7) }
 0x2a0   : > { %v819_v24 = vadd.f32 %v818_v22, %v817_v20  ;;  %v830_v25 = vrot.slane %v829_v23, 2  ;;  %1718 = vmatpush3.xpose.msra.mxu0 (%p836_p7), %v2013_v35  ;;  %1725 = vmatpush3.xpose.msra.mxu1 (%p836_p7), %v872_v36  ;;  %v871_v42 = vld [vmem:[%s2132_s10 + $0x10] sm:$0xff] (%p836_p7)  ;;  %v850_v53 = vld [vmem:[%s2132_s10 + $0x28] sm:$0xff] (%p836_p7)  ;;  %v849_v54 = vld [vmem:[%s2132_s10 + $0x20] sm:$0xff] (%p836_p7) }
 0x2a1   : > { %1719 = vmatprep.subr.mxu0 (%p836_p7), %v1826_v37  ;;  %1726 = vmatprep.subr.mxu1 (%p836_p7), %v1826_v37 }
 0x2a2   : > { %v820_v26 = vrot.slane %v819_v24, 1  ;;  %v831_v27 = vadd.f32 %v830_v25, %v829_v23 }
 0x2a4   : > { %v821_v29 = vadd.f32 %v820_v26, %v819_v24  ;;  %v832_v30 = vrot.slane %v831_v27, 1  ;;  %1720 = vmatpush3.xpose.msra.mxu0 (%p836_p7), %v2022_v41  ;;  %1727 = vmatpush3.xpose.msra.mxu1 (%p836_p7), %v871_v42 }
 0x2a5   : > { %1731 = vmatprep.subr.mxu0 (%p836_p7), %v1826_v37 }
 0x2a6   : > { %v822_v32 = vadd.f32 %v821_v29, %v814_v28  ;;  %v833_v33 = vadd.f32 %v832_v30, %v831_v27  ;;  %840 = sbr.rel (!%p836_p7) target bundleno = 1377 (0x561), region = 76  ;;  %v1120_v29 = vld [vmem:[%s2131_s9 + $0x8] sm:$0xff] (%p836_p7) }
 0x2a7   : > { %1722 = vmatmul.mubr.f32.vlgmr.msra.gmra.mxu0 (%p836_p7), %v882_v47  ;;  %1729 = vmatmul.mubr.f32.vlgmr.msra.gmra.mxu1 (%p836_p7), %v954_v49 }
 0x2a8   : > { %823 = vst [vmem:[#allocation3] sm:$0x1] %v822_v32  ;;  %v834_v34 = vadd.f32 %v833_v33, %v824_v31  ;;  %1735 = vmatprep.mubr.msk.f32.mxu0 (%p836_p7), %vm1827_vm1, %v1826_v37  ;;  %1740 = vmatprep.mubr.msk.f32.mxu1 (%p836_p7), %vm1121_vm2, %v1119_v62  ;;  %v1203_v31 = vld [vmem:[%s2130_s8] sm:$0xff] (%p836_p7)  ;;  %v1204_v32 = vld [vmem:[%s2130_s8 + $0x8] sm:$0xff] (%p836_p7) }
 0x2aa   : > { %835 = vst [vmem:[#allocation4] sm:$0x1] %v834_v34 }
 0x2af   : > { %v841_v38 = vld [vmem:[#allocation3] sm:$0x1] }
 0x2b0   : > { %v842_v39 = vmul.f32 0.0625, %v841_v38 }
 0x2b1   : > { %v843_v40 = vld [vmem:[#allocation4] sm:$0x1] }
 0x2b2   : > { %v844_v43 = vmul.f32 0.0625, %v843_v40  ;;  %v845_v44 = vmul.f32 %v842_v39, %v842_v39  ;;  %v855_v52 = vrot.slane %v842_v39, %v854_v51 }
 0x2b4   : > { %v846_v48 = vsub.f32 %v844_v43, %v845_v44  ;;  %v858_v55 = vsub.f32 %v850_v53, %v855_v52  ;;  %v857_v56 = vsub.f32 %v849_v54, %v855_v52 }
 0x2b6   : > { %v847_v50 = vadd.f32 1e-05, %v846_v48 }
 0x2b8   : > { %1795 = vrsqrt.f32 %v847_v50 }
 0x2c5   : > { %v1796_v57 = vpop.eup %1795 }
 0x2c6   : > { %v863_v58 = vrot.slane %v1796_v57, %v854_v51 }
 0x2c8   : > { %v2047_v59 = vmul.f32 %v863_v58, %v858_v55  ;;  %v2049_v60 = vmul.f32 %v863_v58, %v857_v56 }
 0x2ca   : > { %868 = vst [vmem:[%s2132_s10 + $0x28] sm:$0xff] %v2047_v59  ;;  %1732 = vmatpush3.xpose.msra.mxu0 %v2047_v59  ;;  %867 = vst [vmem:[%s2132_s10 + $0x20] sm:$0xff] %v2049_v60 }
 0x2cb   : > { %1733 = vmatprep.subr.mxu0 %v1826_v37 }
 0x2ce   : > { %1734 = vmatpush3.xpose.msra.mxu0 %v2049_v60 }
 0x2cf   : > { %1750 = vmatprep.subr.mxu0 %v872_v36 }
 0x2d1   : > { %1736 = vmatmul.mubr.f32.vlgmr.msra.gmra.mxu0 %v1026_v61 }
 0x2d2   : > { %1751 = vmatpush3.msra.mxu0 %v872_v36 }
 0x2d3   : > { %1752 = vmatprep.subr.mxu0 %v871_v42 }
 0x2d4   : > { %1753 = vmatpush3.msra.mxu0 %v871_v42 }
 0x367   : > { %v949_v63 = vpop.f32.mrf.mxu0  ;;  %v1021_v0 = vpop.f32.mrf.mxu1 }
 0x368   : > { %v953_v4 = vadd.f32 %v949_v63, %v879_v3 }
 0x369   : > { %v1723_v1 = vpop.f32.mrf.mxu0  ;;  %v1730_v2 = vpop.f32.mrf.mxu1 }
 0x36a   : > { %v1025_v5 = vadd.f32 %v1021_v0, %v953_v4 }
 0x391   : > { %v1093_v6 = vpop.f32.mrf.mxu0 }
 0x392   : > { %v1097_v8 = vadd.f32 %v1093_v6, %v1025_v5 }
 0x393   : > { %v1737_v9 = vpop.f32.mrf.mxu0 }
 0x394   : > { %v1099_v10 = vsel %vm1098_vm3, %v1097_v8, -1e+30 }
 0x395   : > { %v1100_v11 = vsel %vm513_vm0, %v1099_v10, -inf }
 0x396   : > { %v1101_v12 = vrot.slane %v1100_v11, 4 }
 0x398   : > { %v1102_v13 = vmax.f32 %v1100_v11, %v1101_v12 }
 0x39a   : > { %v1103_v14 = vrot.slane %v1102_v13, 2 }
 0x39c   : > { %v1104_v15 = vmax.f32 %v1102_v13, %v1103_v14 }
 0x39e   : > { %v1105_v16 = vrot.slane %v1104_v15, 1 }
 0x3a0   : > { %v1106_v17 = vmax.f32 %v1104_v15, %v1105_v16 }
 0x3a2   : > { %v1107_v18 = vsub.f32 %v1099_v10, %v1106_v17 }
 0x3a4   : > { %v1108_v19 = vmul.f32 1.442695, %v1107_v18 }
 0x3a6   : > { %1797 = vpow2.f32 %v1108_v19 }
 0x3b3   : > { %v1798_v20 = vpop.eup %1797 }
 0x3b4   : > { %v1110_v21 = vsel %vm513_vm0, %v1798_v20, 0.0 }
 0x3b5   : > { %v1111_v22 = vrot.slane %v1110_v21, 4 }
 0x3b7   : > { %v1112_v23 = vadd.f32 %v1111_v22, %v1110_v21 }
 0x3b9   : > { %v1113_v7 = vrot.slane %v1112_v23, 2 }
 0x3bb   : > { %v1114_v24 = vadd.f32 %v1113_v7, %v1112_v23 }
 0x3bd   : > { %v1115_v25 = vrot.slane %v1114_v24, 1 }
 0x3bf   : > { %v1116_v26 = vadd.f32 %v1115_v25, %v1114_v24 }
 0x3c1   : > { %1799 = vrcp.f32 %v1116_v26 }
 0x3ce   : > { %v1800_v27 = vpop.eup %1799 }
 0x3cf   : > { %v1118_v28 = vmul.f32 %v1800_v27, %v1798_v20 }
 0x3d1   : > { %1738 = vmatprep.subr.mxu1 %v1118_v28 }
 0x3d2   : > { %1739 = vmatpush3.msra.mxu1 %v1118_v28 }
 0x3d3   : > { %1741 = vmatmul.mubr.msk.f32.vlgmr.msra.gmra.mxu1 %vm1121_vm2, %v1120_v29  ;;  %1743 = vmatprep.subr.mxu1 %v2013_v35 }
 0x3d4   : > { %1744 = vmatpush3.msra.mxu1 %v2013_v35 }
 0x3d5   : > { %1745 = vmatprep.subr.mxu1 %v2022_v41 }
 0x3d6   : > { %1746 = vmatpush3.msra.mxu1 %v2022_v41 }
 0x3d7   : > { %1757 = vmatprep.subr.mxu1 %v2047_v59 }
 0x493   : > { %v1742_v30 = vpop.f32.mrf.mxu1 }
 0x494   : > { %v1206_v36 = vmul.f32 %v1742_v30, %v1204_v32 }
 0x495   : > { %v1194_v33 = vpop.f32.mrf.mxu1 }
 0x496   : > { %v1205_v34 = vmul.f32 %v1203_v31, %v1194_v33 }
 0x498   : > { %1747 = vmatprep.mubr.msk.f32.mxu1 %vm513_vm0, %v1205_v34  ;;  %1754 = vmatprep.mubr.msk.f32.mxu0 %vm513_vm0, %v1205_v34 }
 0x499   : > { %1748 = vmatmul.mubr.msk.f32.vlgmr.msra.gmra.mxu1 %vm513_vm0, %v1206_v36  ;;  %1755 = vmatmul.mubr.msk.f32.vlgmr.msra.gmra.mxu0 %vm513_vm0, %v1206_v36 }
 0x49a   : > { %1758 = vmatpush3.msra.mxu1 %v2047_v59  ;;  %1761 = vmatprep.mubr.msk.f32.mxu1 %vm513_vm0, %v1205_v34 }
 0x49b   : > { %1759 = vmatprep.subr.mxu1 %v2049_v60 }
 0x49c   : > { %1760 = vmatpush3.msra.mxu1 %v2049_v60 }
 0x49d   : > { %1762 = vmatmul.mubr.msk.f32.vlgmr.msra.gmra.mxu1 %vm513_vm0, %v1206_v36 }
 0x559   : > { %v1749_v35 = vpop.f32.mrf.mxu1  ;;  %v1756_v37 = vpop.f32.mrf.mxu0 }
 0x55a   : > { %1289 = vst [vmem:[%s2133_s11 + $0x8] sm:$0xff] %v1749_v35  ;;  %1366 = vst [vmem:[%s2133_s11 + $0x18] sm:$0xff] %v1756_v37 }
 0x55b   : > { %v1279_v38 = vpop.f32.mrf.mxu1  ;;  %v1356_v39 = vpop.f32.mrf.mxu0 }
 0x55c   : > { %1288 = vst [vmem:[%s2133_s11] sm:$0xff] %v1279_v38  ;;  %1365 = vst [vmem:[%s2133_s11 + $0x10] sm:$0xff] %v1356_v39 }
 0x55d   : > { %v1763_v40 = vpop.f32.mrf.mxu1 }
 0x55e   : > { %1443 = vst [vmem:[%s2133_s11 + $0x28] sm:$0xff] %v1763_v40 }
 0x55f   : > { %v1433_v41 = vpop.f32.mrf.mxu1 }
 0x560   : > { %1442 = vst [vmem:[%s2133_s11 + $0x20] sm:$0xff] %v1433_v41 }
 0x561 PF: > { %s22_s19 = sadd.s32 1, %s1823_s19   ;;  %s2134_s17 = smov %s1819_s18 }
 0x562   : > { %p19_p8 = scmp.ge.s32.totalorder %s22_s19, 5   ;;  %s2135_s18 = smov %s2137_s20 }
 0x564   :  { %21 = sbr.rel (!%p19_p8) target bundleno = 2 (0x2), region = 125 }

</bundles_post_ra>
